<compile_context>
chip_gen: v5e
topology: v5e:2x2
jax: 0.10.0
libtpu: 0.0.40
codegen_flags: <defaults>
</compile_context>

<pallas_src>
import jax
import jax.numpy as jnp
import numpy as np
from jax import lax
from jax.experimental import pallas as pl
from jax.experimental.pallas import tpu as pltpu


# ----------------------------------------------------------------------------
# Parameter prep (plain JAX glue): spectral normalization == SN.W_() with
# num_svs=1, num_itrs=1 (gram_schmidt over an empty list is the identity).
# ----------------------------------------------------------------------------
def sn_weight(W, u, eps=1e-12):
    """W: (out, in) flattened 1x1 conv weight, u: (1, out). Returns W / sv."""
    # TODO(synk): the training-time in-place update of the `u`/`sv` buffers is a
    # side effect outside the forward math and is not replicated here.
    Wm = W.reshape(W.shape[0], -1)
    v = u @ Wm                                      # (1, in)
    v = v / jnp.maximum(jnp.linalg.norm(v), eps)    # F.normalize
    u_new = v @ Wm.T                                # (1, out)
    u_new = u_new / jnp.maximum(jnp.linalg.norm(u_new), eps)
    sv = jnp.squeeze((v @ Wm.T) @ u_new.T)          # scalar singular value est.
    return W / sv


# ----------------------------------------------------------------------------
# Pallas kernel
# ----------------------------------------------------------------------------
def _dot(a, b, dims):
    """2-D MXU contraction with f32 accumulation, no explicit transposes."""
    return lax.dot_general(a, b, (dims, ((), ())),
                           preferred_element_type=jnp.float32)


def attention_kernel(x_ref, xq_ref, wt_ref, wpg_ref, wo_ref, gamma_ref,
                     o_ref, phi_ref, g_ref):
    # x_ref   : (1, C, TQ)      f32   query-tile columns of x (channel-major)
    # xq_ref  : (1, 4, C, HWk)  bf16  four 2x2-pool quadrant subsamplings of x
    # wt_ref  : (C8, C)         bf16
    # wpg_ref : (C8+C2, C)      bf16  fused [w_phi; w_g]
    # wo_ref  : (C, C2)         bf16
    # gamma_ref: (1,)           f32   SMEM scalar
    # o_ref   : (1, C, TQ)      f32
    # phi_ref : (C8, HWk)       f32   VMEM scratch (pooled phi, persists over q-tiles)
    # g_ref   : (C2, HWk)       f32   VMEM scratch (pooled g)
    C8 = phi_ref.shape[0]

    # ---- once per batch element: pooled key/value projections into scratch ----
    @pl.when(pl.program_id(1) == 0)
    def _():
        wpg = wpg_ref[...]
        acc = _dot(wpg, xq_ref[0, 0], ((1,), (0,)))          # (C8+C2, HWk) f32
        for q in range(1, 4):
            acc = jnp.maximum(acc, _dot(wpg, xq_ref[0, q], ((1,), (0,))))
        phi_ref[...] = acc[:C8, :]                           # maxpool(phi(x))
        g_ref[...] = acc[C8:, :]                             # maxpool(g(x))

    # ---- per query tile ----
    x_f32 = x_ref[0]                                         # (C, TQ) f32
    x_bf = x_f32.astype(jnp.bfloat16)

    theta = _dot(wt_ref[...], x_bf, ((1,), (0,)))            # (C8, TQ) f32
    phi_p = phi_ref[...].astype(jnp.bfloat16)                # (C8, HWk)
    g_p = g_ref[...].astype(jnp.bfloat16)                    # (C2, HWk)

    # logits: contract the channel axes of theta / phi directly (no .T)
    logits = _dot(theta.astype(jnp.bfloat16), phi_p, ((0,), (0,)))  # (TQ, HWk) f32

    # softmax kept in f32; normalization deferred until after the attend
    m = jnp.max(logits, axis=-1, keepdims=True)
    p = jnp.exp(logits - m)                                  # unnormalized, f32
    p_bf = p.astype(jnp.bfloat16)

    o_un = _dot(g_p, p_bf, ((1,), (1,)))                     # (C2, TQ) f32
    ones_k = jnp.ones((1, p_bf.shape[1]), jnp.bfloat16)
    denom = _dot(ones_k, p_bf, ((1,), (1,)))                 # (1, TQ) f32 row sums
    o_feat = o_un * pl.reciprocal(denom, approx=True)        # (C2, TQ)

    o_out = _dot(wo_ref[...], o_feat.astype(jnp.bfloat16), ((1,), (0,)))  # (C, TQ)

    o_ref[0] = gamma_ref[0] * o_out + x_f32


# ----------------------------------------------------------------------------
# Wrapper
# ----------------------------------------------------------------------------
def attention_forward(x_nchw, params):
    """x_nchw: (B, C, H, W) float32. Returns (B, C, H, W) float32."""
    B, C, H, W = x_nchw.shape
    assert C % 8 == 0 and H % 2 == 0 and W % 2 == 0
    C8, C2 = C // 8, C // 2
    HW, HWk = H * W, (H // 2) * (W // 2)

    # spectral-norm the conv weights (parameter prep, plain JAX); keep (out, in)
    wt = sn_weight(params["w_theta"], params["u_theta"]).astype(jnp.bfloat16)   # (C8, C)
    wp = sn_weight(params["w_phi"], params["u_phi"])                            # (C8, C)
    wg = sn_weight(params["w_g"], params["u_g"])                                # (C2, C)
    wo = sn_weight(params["w_o"], params["u_o"]).astype(jnp.bfloat16)           # (C, C2)
    wpg = jnp.concatenate([wp, wg], axis=0).astype(jnp.bfloat16)                # (C8+C2, C)

    x_f32 = x_nchw.astype(jnp.float32)
    x_flat = x_f32.reshape(B, C, HW)            # channel-major, spatial on lanes (free)

    # 2x2-pool quadrant subsamplings of x (strided slices in XLA, cheap);
    # projecting each and taking the elementwise max == max-pool of the projection.
    xq = jnp.stack([x_f32[:, :, 0::2, 0::2], x_f32[:, :, 0::2, 1::2],
                    x_f32[:, :, 1::2, 0::2], x_f32[:, :, 1::2, 1::2]], axis=1)
    xq = xq.reshape(B, 4, C, HWk).astype(jnp.bfloat16)

    gamma = params["gamma"].reshape(1).astype(jnp.float32)

    # Query tiling: 128-wide tiles when possible (caps VMEM, several pipeline
    # steps per batch element); otherwise a single tile covering all of HW.
    TQ = 128 if (HW % 128 == 0 and HW > 128) else HW
    nQ = HW // TQ

    out = pl.pallas_call(
        attention_kernel,
        out_shape=jax.ShapeDtypeStruct((B, C, HW), jnp.float32),
        grid=(B, nQ),
        in_specs=[
            pl.BlockSpec((1, C, TQ), lambda b, q: (b, 0, q)),          # x (queries)
            pl.BlockSpec((1, 4, C, HWk), lambda b, q: (b, 0, 0, 0)),   # x quadrants (keys)
            pl.BlockSpec((C8, C), lambda b, q: (0, 0)),                # w_theta
            pl.BlockSpec((C8 + C2, C), lambda b, q: (0, 0)),           # [w_phi; w_g]
            pl.BlockSpec((C, C2), lambda b, q: (0, 0)),                # w_o
            pl.BlockSpec(memory_space=pltpu.MemorySpace.SMEM),         # gamma (1,)
        ],
        out_specs=pl.BlockSpec((1, C, TQ), lambda b, q: (b, 0, q)),
        scratch_shapes=[
            pltpu.VMEM((C8, HWk), jnp.float32),   # pooled phi, reused across q-tiles
            pltpu.VMEM((C2, HWk), jnp.float32),   # pooled g
        ],
        compiler_params=pltpu.CompilerParams(
            dimension_semantics=("parallel", "arbitrary")),
    )(x_flat, xq, wt, wpg, wo, gamma)

    return out.reshape(B, C, H, W)


# ----------------------------------------------------------------------------
# Pure-JAX f32 reference (mirrors the PyTorch forward) for correctness check.
# ----------------------------------------------------------------------------
def attention_reference(x_nchw, params):
    B, C, H, W = x_nchw.shape
    C8, C2 = C // 8, C // 2
    wt = sn_weight(params["w_theta"], params["u_theta"])
    wp = sn_weight(params["w_phi"], params["u_phi"])
    wg = sn_weight(params["w_g"], params["u_g"])
    wo = sn_weight(params["w_o"], params["u_o"])
    gamma = params["gamma"]

    def conv1x1(x, w):  # x: (B,C_in,H,W), w: (C_out,C_in)
        return jnp.einsum("oc,bchw->bohw", w, x)

    def maxpool2(x):    # (B,Cx,H,W) -> (B,Cx,H/2,W/2)
        return jnp.max(x.reshape(B, x.shape[1], H // 2, 2, W // 2, 2), axis=(3, 5))

    theta = conv1x1(x_nchw, wt).reshape(B, C8, H * W)
    phi = maxpool2(conv1x1(x_nchw, wp)).reshape(B, C8, H * W // 4)
    g = maxpool2(conv1x1(x_nchw, wg)).reshape(B, C2, H * W // 4)
    beta = jax.nn.softmax(jnp.einsum("bcq,bck->bqk", theta, phi), axis=-1)
    o = jnp.einsum("bck,bqk->bcq", g, beta).reshape(B, C2, H, W)
    o = conv1x1(o, wo)
    return gamma * o + x_nchw


if __name__ == "__main__":
    B, C, H, W = 2, 64, 16, 16   # ch=64 -> ch//8=8, ch//2=32, HW=256
    C8, C2 = C // 8, C // 2

    key = jax.random.PRNGKey(0)
    keys = jax.random.split(key, 10)

    x = jax.random.normal(keys[0], (B, C, H, W), dtype=jnp.float32)

    params = {
        # conv weights (out, in) -- 1x1 kernels flattened
        "w_theta": 0.1 * jax.random.normal(keys[1], (C8, C), dtype=jnp.float32),
        "w_phi":   0.1 * jax.random.normal(keys[2], (C8, C), dtype=jnp.float32),
        "w_g":     0.1 * jax.random.normal(keys[3], (C2, C), dtype=jnp.float32),
        "w_o":     0.1 * jax.random.normal(keys[4], (C, C2), dtype=jnp.float32),
        # spectral-norm u buffers: randn(1, num_outputs)
        "u_theta": jax.random.normal(keys[5], (1, C8), dtype=jnp.float32),
        "u_phi":   jax.random.normal(keys[6], (1, C8), dtype=jnp.float32),
        "u_g":     jax.random.normal(keys[7], (1, C2), dtype=jnp.float32),
        "u_o":     jax.random.normal(keys[8], (1, C), dtype=jnp.float32),
        # gamma nonzero so the attention path actually gets validated
        # (the module inits it to 0.0, but it is a learnable parameter).
        "gamma": jnp.array(0.5, dtype=jnp.float32),
    }

    out = attention_forward(x, params)
    out = jax.block_until_ready(out)

    ref = attention_reference(x, params)

    # sanity: the attention path contributes (output != plain residual)
    assert float(jnp.max(jnp.abs(out - x))) > 1e-3

    # bf16 MXU operands + approx reciprocal vs the f32 reference -> loose-ish tol
    np.testing.assert_allclose(np.asarray(out), np.asarray(ref), rtol=5e-2, atol=5e-2)

    print("KERNEL_OK")
</pallas_src>

<mosaic_0001>
module attributes {stable_mosaic.version = 11 : i64} {
  func.func @attention_kernel(%arg0: i32, %arg1: i32, %arg2: memref<1x64x128xf32, #tpu.memory_space<vmem>>, %arg3: memref<1x4x64x64xbf16, #tpu.memory_space<vmem>>, %arg4: memref<8x64xbf16, #tpu.memory_space<vmem>>, %arg5: memref<40x64xbf16, #tpu.memory_space<vmem>>, %arg6: memref<64x32xbf16, #tpu.memory_space<vmem>>, %arg7: memref<1xf32, #tpu.memory_space<smem>>, %arg8: memref<1x64x128xf32, #tpu.memory_space<vmem>>, %arg9: memref<8x64xf32, #tpu.memory_space<vmem>>, %arg10: memref<32x64xf32, #tpu.memory_space<vmem>>) attributes {dimension_semantics = [#tpu.dimension_semantics<parallel>, #tpu.dimension_semantics<arbitrary>], iteration_bounds = array<i64: 2, 2>, scalar_prefetch = 0 : i64, scratch_operands = 2 : i64, tpu.core_type = #tpu.core_type<tc>, window_params = [{transform_indices = @transform_0, window_bounds = array<i64: 1, 64, 128>}, {transform_indices = @transform_1, window_bounds = array<i64: 1, 4, 64, 64>}, {pipeline_mode = #tpu.pipeline_mode<synchronous>, transform_indices = @transform_2, window_bounds = array<i64: 8, 64>}, {pipeline_mode = #tpu.pipeline_mode<synchronous>, transform_indices = @transform_3, window_bounds = array<i64: 40, 64>}, {pipeline_mode = #tpu.pipeline_mode<synchronous>, transform_indices = @transform_4, window_bounds = array<i64: 64, 32>}, {transform_indices = @transform_5, window_bounds = array<i64: 1>}, {transform_indices = @transform_6, window_bounds = array<i64: 1, 64, 128>}]} {
    %c0_i32 = arith.constant 0 : i32
    %0 = arith.cmpi eq, %arg1, %c0_i32 : i32
    %1 = arith.extui %0 : i1 to i32
    %c0_i32_0 = arith.constant 0 : i32
    %2 = arith.cmpi ne, %1, %c0_i32_0 : i32
    scf.if %2 {
      %c0_21 = arith.constant 0 : index
      %c0_22 = arith.constant 0 : index
      %36 = vector.load %arg5[%c0_21, %c0_22] : memref<40x64xbf16, #tpu.memory_space<vmem>>, vector<40x64xbf16>
      %c0_23 = arith.constant 0 : index
      %c0_24 = arith.constant 0 : index
      %c0_25 = arith.constant 0 : index
      %c0_26 = arith.constant 0 : index
      %37 = vector.load %arg3[%c0_23, %c0_24, %c0_25, %c0_26] : memref<1x4x64x64xbf16, #tpu.memory_space<vmem>>, vector<1x1x64x64xbf16>
      %38 = vector.shape_cast %37 : vector<1x1x64x64xbf16> to vector<64x64xbf16>
      %cst_27 = arith.constant dense<0.000000e+00> : vector<40x64xf32>
      %39 = tpu.matmul %36, %38, %cst_27 {dimension_numbers = #tpu.dot_dimension_numbers<[1], [0], [0], [1], [0, 0, 1, 1], [], []>} : vector<40x64xbf16>, vector<64x64xbf16>, vector<40x64xf32> -> vector<40x64xf32>
      %c0_28 = arith.constant 0 : index
      %c1 = arith.constant 1 : index
      %c0_29 = arith.constant 0 : index
      %c0_30 = arith.constant 0 : index
      %40 = vector.load %arg3[%c0_28, %c1, %c0_29, %c0_30] : memref<1x4x64x64xbf16, #tpu.memory_space<vmem>>, vector<1x1x64x64xbf16>
      %41 = vector.shape_cast %40 : vector<1x1x64x64xbf16> to vector<64x64xbf16>
      %cst_31 = arith.constant dense<0.000000e+00> : vector<40x64xf32>
      %42 = tpu.matmul %36, %41, %cst_31 {dimension_numbers = #tpu.dot_dimension_numbers<[1], [0], [0], [1], [0, 0, 1, 1], [], []>} : vector<40x64xbf16>, vector<64x64xbf16>, vector<40x64xf32> -> vector<40x64xf32>
      %43 = arith.maximumf %39, %42 : vector<40x64xf32>
      %c0_32 = arith.constant 0 : index
      %c2 = arith.constant 2 : index
      %c0_33 = arith.constant 0 : index
      %c0_34 = arith.constant 0 : index
      %44 = vector.load %arg3[%c0_32, %c2, %c0_33, %c0_34] : memref<1x4x64x64xbf16, #tpu.memory_space<vmem>>, vector<1x1x64x64xbf16>
      %45 = vector.shape_cast %44 : vector<1x1x64x64xbf16> to vector<64x64xbf16>
      %cst_35 = arith.constant dense<0.000000e+00> : vector<40x64xf32>
      %46 = tpu.matmul %36, %45, %cst_35 {dimension_numbers = #tpu.dot_dimension_numbers<[1], [0], [0], [1], [0, 0, 1, 1], [], []>} : vector<40x64xbf16>, vector<64x64xbf16>, vector<40x64xf32> -> vector<40x64xf32>
      %47 = arith.maximumf %43, %46 : vector<40x64xf32>
      %c0_36 = arith.constant 0 : index
      %c3 = arith.constant 3 : index
      %c0_37 = arith.constant 0 : index
      %c0_38 = arith.constant 0 : index
      %48 = vector.load %arg3[%c0_36, %c3, %c0_37, %c0_38] : memref<1x4x64x64xbf16, #tpu.memory_space<vmem>>, vector<1x1x64x64xbf16>
      %49 = vector.shape_cast %48 : vector<1x1x64x64xbf16> to vector<64x64xbf16>
      %cst_39 = arith.constant dense<0.000000e+00> : vector<40x64xf32>
      %50 = tpu.matmul %36, %49, %cst_39 {dimension_numbers = #tpu.dot_dimension_numbers<[1], [0], [0], [1], [0, 0, 1, 1], [], []>} : vector<40x64xbf16>, vector<64x64xbf16>, vector<40x64xf32> -> vector<40x64xf32>
      %51 = arith.maximumf %47, %50 : vector<40x64xf32>
      %52 = vector.extract_strided_slice %51 {offsets = [0, 0], sizes = [8, 64], strides = [1, 1]} : vector<40x64xf32> to vector<8x64xf32>
      %c0_40 = arith.constant 0 : index
      %c0_41 = arith.constant 0 : index
      %53 = vector.load %arg9[%c0_40, %c0_41] : memref<8x64xf32, #tpu.memory_space<vmem>>, vector<8x64xf32>
      tpu.vector_store %arg9[%c0_40, %c0_41], %52 {strides = array<i32>} : memref<8x64xf32, #tpu.memory_space<vmem>>, vector<8x64xf32>,
      %54 = vector.extract_strided_slice %51 {offsets = [8, 0], sizes = [32, 64], strides = [1, 1]} : vector<40x64xf32> to vector<32x64xf32>
      %c0_42 = arith.constant 0 : index
      %c0_43 = arith.constant 0 : index
      %55 = vector.load %arg10[%c0_42, %c0_43] : memref<32x64xf32, #tpu.memory_space<vmem>>, vector<32x64xf32>
      tpu.vector_store %arg10[%c0_42, %c0_43], %54 {strides = array<i32>} : memref<32x64xf32, #tpu.memory_space<vmem>>, vector<32x64xf32>,
    } else {
    }
    %c0 = arith.constant 0 : index
    %c0_1 = arith.constant 0 : index
    %c0_2 = arith.constant 0 : index
    %3 = vector.load %arg2[%c0, %c0_1, %c0_2] : memref<1x64x128xf32, #tpu.memory_space<vmem>>, vector<1x64x128xf32>
    %4 = vector.shape_cast %3 : vector<1x64x128xf32> to vector<64x128xf32>
    %5 = arith.truncf %4 : vector<64x128xf32> to vector<64x128xbf16>
    %c0_3 = arith.constant 0 : index
    %c0_4 = arith.constant 0 : index
    %6 = vector.load %arg4[%c0_3, %c0_4] : memref<8x64xbf16, #tpu.memory_space<vmem>>, vector<8x64xbf16>
    %cst = arith.constant dense<0.000000e+00> : vector<8x128xf32>
    %7 = tpu.matmul %6, %5, %cst {dimension_numbers = #tpu.dot_dimension_numbers<[1], [0], [0], [1], [0, 0, 1, 1], [], []>} : vector<8x64xbf16>, vector<64x128xbf16>, vector<8x128xf32> -> vector<8x128xf32>
    %c0_5 = arith.constant 0 : index
    %c0_6 = arith.constant 0 : index
    %8 = vector.load %arg9[%c0_5, %c0_6] : memref<8x64xf32, #tpu.memory_space<vmem>>, vector<8x64xf32>
    %9 = arith.truncf %8 : vector<8x64xf32> to vector<8x64xbf16>
    %c0_7 = arith.constant 0 : index
    %c0_8 = arith.constant 0 : index
    %10 = vector.load %arg10[%c0_7, %c0_8] : memref<32x64xf32, #tpu.memory_space<vmem>>, vector<32x64xf32>
    %11 = arith.truncf %10 : vector<32x64xf32> to vector<32x64xbf16>
    %12 = arith.truncf %7 : vector<8x128xf32> to vector<8x128xbf16>
    %cst_9 = arith.constant dense<0.000000e+00> : vector<128x64xf32>
    %13 = tpu.matmul %12, %9, %cst_9 {dimension_numbers = #tpu.dot_dimension_numbers<[0], [0], [1], [1], [0, 1, 1, 1], [], []>} : vector<8x128xbf16>, vector<8x64xbf16>, vector<128x64xf32> -> vector<128x64xf32>
    %cst_10 = arith.constant dense<0xFF800000> : vector<128xf32>
    %14 = vector.multi_reduction <maximumf>, %13, %cst_10 [1] : vector<128x64xf32> to vector<128xf32>
    %15 = vector.shape_cast %14 : vector<128xf32> to vector<128x1xf32>
    %16 = vector.broadcast %15 : vector<128x1xf32> to vector<128x64xf32>
    %17 = arith.subf %13, %16 : vector<128x64xf32>
    %18 = math.exp %17 : vector<128x64xf32>
    %19 = arith.truncf %18 : vector<128x64xf32> to vector<128x64xbf16>
    %cst_11 = arith.constant dense<0.000000e+00> : vector<32x128xf32>
    %20 = tpu.matmul %11, %19, %cst_11 {dimension_numbers = #tpu.dot_dimension_numbers<[1], [1], [0], [0], [0, 0, 1, 0], [], []>} : vector<32x64xbf16>, vector<128x64xbf16>, vector<32x128xf32> -> vector<32x128xf32>
    %cst_12 = arith.constant 1.000000e+00 : bf16
    %21 = vector.broadcast %cst_12 : bf16 to vector<1x64xbf16>
    %cst_13 = arith.constant dense<0.000000e+00> : vector<1x128xf32>
    %22 = tpu.matmul %21, %19, %cst_13 {dimension_numbers = #tpu.dot_dimension_numbers<[1], [1], [0], [0], [0, 0, 1, 0], [], []>} : vector<1x64xbf16>, vector<128x64xbf16>, vector<1x128xf32> -> vector<1x128xf32>
    %23 = tpu.reciprocal %22 {approx = true} : vector<1x128xf32> -> vector<1x128xf32>
    %24 = vector.broadcast %23 : vector<1x128xf32> to vector<32x128xf32>
    %25 = arith.mulf %20, %24 : vector<32x128xf32>
    %c0_14 = arith.constant 0 : index
    %c0_15 = arith.constant 0 : index
    %26 = vector.load %arg6[%c0_14, %c0_15] : memref<64x32xbf16, #tpu.memory_space<vmem>>, vector<64x32xbf16>
    %27 = arith.truncf %25 : vector<32x128xf32> to vector<32x128xbf16>
    %cst_16 = arith.constant dense<0.000000e+00> : vector<64x128xf32>
    %28 = tpu.matmul %26, %27, %cst_16 {dimension_numbers = #tpu.dot_dimension_numbers<[1], [0], [0], [1], [0, 0, 1, 1], [], []>} : vector<64x32xbf16>, vector<32x128xbf16>, vector<64x128xf32> -> vector<64x128xf32>
    %c0_17 = arith.constant 0 : index
    %29 = memref.load %arg7[%c0_17] : memref<1xf32, #tpu.memory_space<smem>>
    %30 = vector.broadcast %29 : f32 to vector<64x128xf32>
    %31 = arith.mulf %30, %28 : vector<64x128xf32>
    %32 = arith.addf %31, %4 : vector<64x128xf32>
    %c0_18 = arith.constant 0 : index
    %c0_19 = arith.constant 0 : index
    %c0_20 = arith.constant 0 : index
    %33 = vector.load %arg8[%c0_18, %c0_19, %c0_20] : memref<1x64x128xf32, #tpu.memory_space<vmem>>, vector<1x64x128xf32>
    %34 = vector.shape_cast %33 : vector<1x64x128xf32> to vector<64x128xf32>
    %35 = vector.shape_cast %32 : vector<64x128xf32> to vector<1x64x128xf32>
    tpu.vector_store %arg8[%c0_18, %c0_19, %c0_20], %35 {strides = array<i32>} : memref<1x64x128xf32, #tpu.memory_space<vmem>>, vector<1x64x128xf32>,
    return
  }
  func.func @transform_0(%arg0: i32, %arg1: i32) -> (i32, i32, i32) {
    %c0_i32 = arith.constant 0 : i32
    %c0_i32_0 = arith.constant 0 : i32
    return %arg0, %c0_i32, %arg1 : i32, i32, i32
  }
  func.func @transform_1(%arg0: i32, %arg1: i32) -> (i32, i32, i32, i32) {
    %c0_i32 = arith.constant 0 : i32
    %c0_i32_0 = arith.constant 0 : i32
    %c0_i32_1 = arith.constant 0 : i32
    %c0_i32_2 = arith.constant 0 : i32
    return %arg0, %c0_i32, %c0_i32_0, %c0_i32_1 : i32, i32, i32, i32
  }
  func.func @transform_2(%arg0: i32, %arg1: i32) -> (i32, i32) {
    %c0_i32 = arith.constant 0 : i32
    %c0_i32_0 = arith.constant 0 : i32
    %c0_i32_1 = arith.constant 0 : i32
    return %c0_i32, %c0_i32_0 : i32, i32
  }
  func.func @transform_3(%arg0: i32, %arg1: i32) -> (i32, i32) {
    %c0_i32 = arith.constant 0 : i32
    %c0_i32_0 = arith.constant 0 : i32
    %c0_i32_1 = arith.constant 0 : i32
    return %c0_i32, %c0_i32_0 : i32, i32
  }
  func.func @transform_4(%arg0: i32, %arg1: i32) -> (i32, i32) {
    %c0_i32 = arith.constant 0 : i32
    %c0_i32_0 = arith.constant 0 : i32
    %c0_i32_1 = arith.constant 0 : i32
    return %c0_i32, %c0_i32_0 : i32, i32
  }
  func.func @transform_5(%arg0: i32, %arg1: i32) -> i32 {
    %c0_i32 = arith.constant 0 : i32
    %c0_i32_0 = arith.constant 0 : i32
    return %c0_i32 : i32
  }
  func.func @transform_6(%arg0: i32, %arg1: i32) -> (i32, i32, i32) {
    %c0_i32 = arith.constant 0 : i32
    %c0_i32_0 = arith.constant 0 : i32
    return %arg0, %c0_i32, %arg1 : i32, i32, i32
  }
}

</mosaic_0001>

<bundles_post_ra>
// kernel: tpu_custom_call.1
= control target key start
LH: loop header
LB: loop body
LE: loop exit
PB: predicated region body
PF: predicated region fallthrough
CT: control target
= control target key end

     0   :  { %s2127_s0 = inlined_call_operand.hbm [shape: f32[2,64,256], index: 0, kind: input, shape index: {}]   ;;  %s2128_s1 = inlined_call_operand.hbm [shape: bf16[2,4,64,64], index: 1, kind: input, shape index: {}]   ;;  %s2129_s2 = inlined_call_operand.vmem [shape: bf16[8,64], index: 2, kind: input, shape index: {}]   ;;  %s2130_s3 = inlined_call_operand.vmem [shape: bf16[40,64], index: 3, kind: input, shape index: {}]   ;;  %s2131_s4 = inlined_call_operand.vmem [shape: bf16[64,32], index: 4, kind: input, shape index: {}]   ;;  %s2132_s5 = inlined_call_operand.<no memory space> [shape: f32[1], index: 5, kind: input, shape index: {}]   ;;  %s2133_s6 = inlined_call_operand.hbm [shape: f32[2,64,256], index: 6, kind: output, shape index: {}]  }
   0x1   :  { %2142 = sst [smem:[#allocation19_spill]] %s2127_s0 }
   0x2   :  { %2143 = sst [smem:[#allocation20_spill]] %s2133_s6 }
   0x3   :  { %11 = sst [smem:[#allocation4]] %s2132_s5 }
   0x4   :  { %12 = vsyncpa [#allocation6], 0 }
   0x5   :  { %14 = vsyncpa [#allocation6 + $0x1], 0 }
   0x6   :  { %15 = vsyncpa [#allocation9], 0 }
   0x7   :  { %17 = vsyncpa [#allocation9 + $0x1], 0 }
   0x8   :  { %18 = vsyncpa [#allocation7], 0 }
   0x9   :  { %20 = vsyncpa [#allocation7 + $0x1], 0  ;;  %s1712_s23 = smov 0   ;;  %s1714_s24 = smov 0  }
   0xa   :  { %s1716_s25 = smov 0   ;;  %s1718_s26 = smov 0  }
   0xb   :  { %s1720_s27 = smov 0   ;;  %s1722_s28 = smov 0  }
   0xc   :  { %s1724_s29 = smov 0   ;;  %s1726_s5 = smov 0  }
   0xd   :  { %s1728_s30 = smov 0   ;;  %s1730_s7 = smov 0  }
   0xe   :  { %s1732_s8 = smov 0  }
   0xf LB: > { %2144 = sst [smem:[#allocation14_spill]] %s1659_s7  ;;  %s2134_s9 = sadd.s32 4294967295, %s1663_s8   ;;  %s1663_s8 = sphi %s1732_s8, %s26_s8   ;;  %s1659_s7 = sphi %s1730_s7, %s2162_s7   ;;  %s1655_s30 = sphi %s1728_s30, %s2170_s30   ;;  %s1651_s5 = sphi %s1726_s5, %s2160_s5   ;;  %s1647_s29 = sphi %s1724_s29, %s2169_s29   ;;  %s1643_s28 = sphi %s1722_s28, %s2168_s28   ;;  %s1639_s27 = sphi %s1720_s27, %s2167_s27   ;;  %s1635_s26 = sphi %s1718_s26, %s2166_s26   ;;  %s1631_s25 = sphi %s1716_s25, %s2165_s25   ;;  %s1627_s24 = sphi %s1714_s24, %s2164_s24   ;;  %s1623_s23 = sphi %s1712_s23, %s2163_s23  }
  0x10   : > { %s1144_s10 = sadd.s32 4294967294, %s1663_s8   ;;  %s35_s11 = sadd.s32 1, %s1655_s30 }
  0x11   : > { %s38_s12 = sadd.s32 1, %s1659_s7  ;;  %p36_p0 = scmp.ge.s32.totalorder %s35_s11, 2 }
  0x12   : > { %s47_s13 = sadd.s32 1, %s1643_s28  ;;  %p54_p1 = scmp.ne.s32.totalorder %s1643_s28, %s1639_s27 }
  0x13   : > { %p55_p2 = scmp.eq.s32.totalorder %s1663_s8, 0  ;;  %s2172_s11 = smov (%p36_p0, %s35_s11), 0 }
  0x14   : > { %2145 = sst [smem:[#allocation15_spill]] %s2172_s11  ;;  %s2174_s12 = smov (!%p36_p0, %s38_s12), %s1659_s7 }
  0x15   : > { %s43_s14 = ssub.s32 %s1655_s30, %s2172_s11  ;;  %p1782_p3 = por %p55_p2, %p54_p1 }
  0x16   : > { %p40_p4 = scmp.ge.s32.totalorder %s2174_s12, 2  ;;  %p60_p5 = scmp.ne.s32.totalorder %s1639_s27, %s1635_s26 }
  0x17   : > { %p196_p6 = scmp.eq.s32.totalorder %s2134_s9, 3  ;;  %p202_p7 = scmp.eq.s32.totalorder %s1144_s10, 3 }
  0x18   : > { %s2176_s12 = smov (%p40_p4, %s2174_s12), 0  ;;  %p1343_p12 = scmp.lt.s32.totalorder %s1663_s8, 4 }
  0x19   : > { %2147 = sst [smem:[#allocation16_spill]] %s2176_s12  ;;  %p1792_p8 = por %p196_p6, %p54_p1 }
  0x1a   : > { %p1799_p9 = por %p202_p7, %p60_p5  ;;  %s1805_s18 = ssub.s32 %s1659_s7, %s2176_s12 }
  0x1b   : > { %s2148_s16 = scalar_select %p1792_p8, 1, 0 }
  0x1c   : > { %s2150_s17 = scalar_select %p1799_p9, 1, 0 }
  0x1d   : > { %2149 = sst [smem:[#allocation17_spill]] %s2148_s16  ;;  %s44_s19 = sor.u32 %s43_s14, %s1805_s18 }
  0x1e   : > { %2151 = sst [smem:[#allocation18_spill]] %s2150_s17  ;;  %p71_p10 = scmp.eq.s32.totalorder %s1805_s18, 0 }
  0x1f   : > { %p45_p11 = scmp.eq.s32.totalorder %s44_s19, 0  ;;  %s234_s20 = sand.u32 1, %s1643_s28  }
  0x20   : > { %s1148_s21 = sshll.u32 %s1659_s7, 4  ;;  %s1147_s10 = sshll.u32 %s234_s20, 6 }
  0x21   : > { %s1813_s22 = scalar_select %p45_p11, %s1643_s28, %s47_s13  }
  0x22   : > { %s242_s9 = sadd.s32 %s1655_s30, %s1148_s21  ;;  %s238_s12 = scalar_lea.vmem [#allocation5], %s1147_s10 }
  0x23   : > { %s1149_s11 = sshll.u32 %s242_s9, 3  ;;  %s247_s17 = sshll.u32 %s238_s12, 4  ;;  %s248_s17 = int_to_ptr.vmem [resolvable:$true] %s247_s17 }
  0x24   : > { %s2152_s0 = sld [smem:[#allocation19_spill]]  ;;  %p1333_p13 = pnand %p1343_p12, %p1782_p3 }
  0x25   : > { %p1153_p0 = scmp.ge.s32.totalorder %s1663_s8, 1  ;;  %s235_s9 = scalar_lea.sflag [#allocation6], %s234_s20 }
  0x26   : > { %s1665_s6 = smov 256   ;;  %s1666_s12 = smov 128  }
  0x27   : > { %p277_p1 = scmp.lt.s32.totalorder %s1663_s8, 5  ;;  %s2154_s15 = sadd.s32 4294967295, %s1663_s8  }
  0x28   : > { %p61_p6 = scmp.eq.s32.totalorder %s2154_s15, 0  ;;  %s73_s19 = sadd.s32 1, %s1631_s25 }
  0x29   : > { %p1825_p4 = pnand %p1153_p0, %p277_p1  ;;  %p80_p7 = scmp.ne.s32.totalorder %s1631_s25, %s1627_s24 }
  0x2a   : > { %s244_s14 = scalar_lea.hbm %s2152_s0, %s1149_s11  ;;  %s1667_s11 = smov 8  }
  0x2b   : > { %s245_s13 = sshll.u32 %s244_s14, 4  ;;  %p1840_p3 = por %p61_p6, %p60_p5  ;;  %s246_s13 = int_to_ptr.hbm [resolvable:$true] %s245_s13 }
  0x2c   : > { %1335 = dma.hbm_to_vmem [thread:$0]  (!%p1333_p13), %s246_s13, 1024, %s248_s17, %s235_s9, %s1665_s6, %s1666_s12, %s1667_s11  }
  0x2d   : > { %s1835_s21 = scalar_select %p71_p10, %s1631_s25, %s73_s19  }
  0x2e   : > { %p86_p11 = scmp.ne.s32.totalorder %s1627_s24, %s1623_s23  ;;  %s257_s17 = sand.u32 1, %s1631_s25  }
  0x2f   : > { %p82_p13 = por %p80_p7, %p55_p2  ;;  %s1150_s14 = sshll.u32 %s257_s17, 7 }
  0x30   : > { %p1851_p0 = por %p86_p11, %p61_p6  ;;  %s1303_s13 = sshll.u32 %s1659_s7, 7 }
  0x31   : > { %s266_s6 = scalar_lea.hbm %s2128_s1, %s1303_s13  ;;  %s261_s12 = scalar_lea.vmem [#allocation8], %s1150_s14 }
  0x32   : > { %s269_s11 = sshll.u32 %s261_s12, 4  ;;  %s267_s15 = sshll.u32 %s266_s6, 4  ;;  %s270_s11 = int_to_ptr.vmem [resolvable:$true] %s269_s11  ;;  %s268_s15 = int_to_ptr.hbm [resolvable:$true] %s267_s15 }
  0x33   : > { %p1336_p5 = pnand %p1343_p12, %p82_p13  ;;  %s258_s23 = scalar_lea.sflag [#allocation9], %s257_s17 }
  0x34   : > { %s1668_s19 = smov 64   ;;  %s1669_s0 = smov 4  }
  0x35   : > { %1338 = dma.hbm_to_vmem [thread:$0]  (!%p1336_p5), %s268_s15, 2048, %s270_s11, %s258_s23, %s1668_s19, %s1668_s19, %s1669_s0  }
  0x36   : > { %281 = sbr.rel (%p1825_p4) target bundleno = 1379 (0x563), region = 44  ;;  %s1864_s7 = sand.u32 (!%p1825_p4), 1, %s1639_s27  }
  0x37   : > { %s1154_s14 = sshll.u32 (!%p1825_p4), %s1864_s7, 6  ;;  %s284_s13 = scalar_lea.sflag (!%p1825_p4), [#allocation6], %s1864_s7 }
  0x38   : > { %s1868_s18 = scalar_lea.vmem (!%p1825_p4), [#allocation5], %s1154_s14 }
  0x3b   : > { %1610 = dma.done.wait (%p1840_p3), %s284_s13, 1024  }
  0x3c   : > { %1612 = vsyncadd (%p1840_p3), %s284_s13, 4294966272  ;;  %s293_s0 = sand.u32 1, %s1627_s24  }
  0x3d   : > { %s1155_s16 = sshll.u32 %s293_s0, 7  ;;  %s294_s17 = scalar_lea.sflag [#allocation9], %s293_s0 }
  0x3e   : > { %s1875_s9 = scalar_lea.vmem [#allocation8], %s1155_s16 }
  0x3f   : > { %1614 = dma.done.wait (%p1851_p0), %s294_s17, 2048  }
  0x40   : > { %1616 = vsyncadd (%p1851_p0), %s294_s17, 4294965248  ;;  %s1881_s6 = scalar_lea.vmem [#allocation10], %s1154_s14  ;;  %p1157_p2 = scmp.ne.s32.totalorder %s1647_s29, 0 }
  0x42   : > { %337 = sbr.rel (%p1157_p2) target bundleno = 262 (0x106), region = 56 }
  0x47   : > { %v1309_v0 = vld [vmem:[%s1875_s9 + $0x18] sm:$0xff]  ;;  %v1308_v4 = vld [vmem:[%s1875_s9 + $0x10] sm:$0xff]  ;;  %v1307_v8 = vld [vmem:[%s1875_s9 + $0x8] sm:$0xff]  ;;  %vm388_vm0 = vcmask 523264  }
  0x48   : > { %v1313_v1 = vld [vmem:[%s1875_s9 + $0x38] sm:$0xff]  ;;  %402 = vmatpush.bf16.msra.mxu0 %v1309_v0  ;;  %v1312_v5 = vld [vmem:[%s1875_s9 + $0x30] sm:$0xff]  ;;  %v1311_v9 = vld [vmem:[%s1875_s9 + $0x28] sm:$0xff] }
  0x49   : > { %v1317_v2 = vld [vmem:[%s1875_s9 + $0x58] sm:$0xff]  ;;  %458 = vmatpush.bf16.msra.mxu1 %v1313_v1  ;;  %v1316_v6 = vld [vmem:[%s1875_s9 + $0x50] sm:$0xff]  ;;  %v1315_v10 = vld [vmem:[%s1875_s9 + $0x48] sm:$0xff] }
  0x4a   : > { %v1321_v3 = vld [vmem:[%s1875_s9 + $0x78] sm:$0xff]  ;;  %519 = vmatpush.bf16.msra.mxu2 %v1317_v2  ;;  %v1320_v7 = vld [vmem:[%s1875_s9 + $0x70] sm:$0xff]  ;;  %v1319_v11 = vld [vmem:[%s1875_s9 + $0x68] sm:$0xff] }
  0x4b   : > { %580 = vmatpush.bf16.msra.mxu3 %v1321_v3  ;;  %v1306_v12 = vld [vmem:[%s1875_s9] sm:$0xff]  ;;  %v1304_v16 = vld [vmem:[%s2130_s3] sm:$0xff]  ;;  %v342_v18 = vld [vmem:[%s2130_s3 + $0x10] sm:$0xf] }
  0x4c   : > { %403 = vmatpush.bf16.msra.mxu0 %v1308_v4  ;;  %v1310_v13 = vld [vmem:[%s1875_s9 + $0x20] sm:$0xff]  ;;  %v360_v19 = vunpack.c.l.b16 %v342_v18 }
  0x4d   : > { %459 = vmatpush.bf16.msra.mxu1 %v1312_v5  ;;  %v1314_v14 = vld [vmem:[%s1875_s9 + $0x40] sm:$0xff] }
  0x4e   : > { %520 = vmatpush.bf16.msra.mxu2 %v1316_v6  ;;  %v1318_v15 = vld [vmem:[%s1875_s9 + $0x60] sm:$0xff]  ;;  %v363_v20 = vpack.c.b16 %v360_v19, %v360_v19 }
  0x4f   : > { %581 = vmatpush.bf16.msra.mxu3 %v1320_v7  ;;  %v1305_v17 = vld [vmem:[%s2130_s3 + $0x8] sm:$0xff] }
  0x50   : > { %404 = vmatpush.bf16.msra.mxu0 %v1307_v8 }
  0x51   : > { %460 = vmatpush.bf16.msra.mxu1 %v1311_v9 }
  0x52   : > { %521 = vmatpush.bf16.msra.mxu2 %v1315_v10 }
  0x53   : > { %582 = vmatpush.bf16.msra.mxu3 %v1319_v11 }
  0x54   : > { %405 = vmatpush.bf16.msra.mxu0 %v1306_v12 }
  0x55   : > { %461 = vmatpush.bf16.msra.mxu1 %v1310_v13 }
  0x56   : > { %522 = vmatpush.bf16.msra.mxu2 %v1314_v14 }
  0x57   : > { %583 = vmatpush.bf16.msra.mxu3 %v1318_v15  ;;  %1182 = vmatmul.msk.bf16.vlgmr.msra.gmra.mxu0 %vm388_vm0, %v1304_v16 }
  0x58   : > { %1209 = vmatmul.msk.bf16.vlgmr.msra.gmra.mxu1 %vm388_vm0, %v1304_v16 }
  0x59   : > { %1236 = vmatmul.msk.bf16.vlgmr.msra.gmra.mxu2 %vm388_vm0, %v1304_v16 }
  0x5a   : > { %1263 = vmatmul.msk.bf16.vlgmr.msra.gmra.mxu3 %vm388_vm0, %v1304_v16 }
  0x67   : > { %1183 = vmatmul.msk.bf16.gmra.mxu0 %vm388_vm0, %v1305_v17 }
  0x68   : > { %1210 = vmatmul.msk.bf16.gmra.mxu1 %vm388_vm0, %v1305_v17 }
  0x69   : > { %1237 = vmatmul.msk.bf16.gmra.mxu2 %vm388_vm0, %v1305_v17 }
  0x6a   : > { %1264 = vmatmul.msk.bf16.gmra.mxu3 %vm388_vm0, %v1305_v17 }
  0x77   : > { %1184 = vmatmul.msk.bf16.gmra.mxu0 %vm388_vm0, %v363_v20 }
  0x78   : > { %1211 = vmatmul.msk.bf16.gmra.mxu1 %vm388_vm0, %v363_v20 }
  0x79   : > { %1238 = vmatmul.msk.bf16.gmra.mxu2 %vm388_vm0, %v363_v20 }
  0x7a   : > { %1265 = vmatmul.msk.bf16.gmra.mxu3 %vm388_vm0, %v363_v20 }
  0xd4   : > { %v407_v21 = vpop.f32.mrf.mxu0 }
  0xd5   : > { %v463_v22 = vpop.f32.mrf.mxu1 }
  0xd6   : > { %v477_v23 = vmax.f32 %v407_v21, %v463_v22 }
  0xdc   : > { %v524_v24 = vpop.f32.mrf.mxu2  ;;  %v409_v27 = vpop.f32.mrf.mxu0 }
  0xdd   : > { %v585_v25 = vpop.f32.mrf.mxu3  ;;  %v538_v26 = vmax.f32 %v477_v23, %v524_v24  ;;  %v465_v28 = vpop.f32.mrf.mxu1 }
  0xde   : > { %v478_v30 = vmax.f32 %v409_v27, %v465_v28 }
  0xdf   : > { %v599_v29 = vmax.f32 %v538_v26, %v585_v25 }
  0xe1   : > { %604 = vst.msk [vmem:[#allocation2] sm:$0xff] %vm388_vm0, %v599_v29 }
  0xe4   : > { %v526_v31 = vpop.f32.mrf.mxu2  ;;  %v412_v34 = vpop.f32.mrf.mxu0 }
  0xe5   : > { %v587_v32 = vpop.f32.mrf.mxu3  ;;  %v539_v33 = vmax.f32 %v478_v30, %v526_v31  ;;  %v468_v35 = vpop.f32.mrf.mxu1 }
  0xe6   : > { %v479_v37 = vmax.f32 %v412_v34, %v468_v35 }
  0xe7   : > { %v600_v36 = vmax.f32 %v539_v33, %v587_v32 }
  0xe9   : > { %605 = vst.msk [vmem:[#allocation3] sm:$0xff] %vm388_vm0, %v600_v36 }
  0xec   : > { %v529_v38 = vpop.f32.mrf.mxu2  ;;  %v414_v41 = vpop.f32.mrf.mxu0 }
  0xed   : > { %v590_v39 = vpop.f32.mrf.mxu3  ;;  %v540_v40 = vmax.f32 %v479_v37, %v529_v38  ;;  %v470_v42 = vpop.f32.mrf.mxu1 }
  0xee   : > { %v480_v44 = vmax.f32 %v414_v41, %v470_v42 }
  0xef   : > { %v601_v43 = vmax.f32 %v540_v40, %v590_v39 }
  0xf1   : > { %606 = vst.msk [vmem:[#allocation3 + $0x8] sm:$0xff] %vm388_vm0, %v601_v43 }
  0xf4   : > { %v531_v45 = vpop.f32.mrf.mxu2  ;;  %v417_v48 = vpop.f32.mrf.mxu0 }
  0xf5   : > { %v592_v46 = vpop.f32.mrf.mxu3  ;;  %v541_v47 = vmax.f32 %v480_v44, %v531_v45  ;;  %v473_v49 = vpop.f32.mrf.mxu1 }
  0xf6   : > { %v481_v51 = vmax.f32 %v417_v48, %v473_v49 }
  0xf7   : > { %v602_v50 = vmax.f32 %v541_v47, %v592_v46 }
  0xf9   : > { %607 = vst.msk [vmem:[#allocation3 + $0x10] sm:$0xff] %vm388_vm0, %v602_v50 }
  0xfc   : > { %v534_v52 = vpop.f32.mrf.mxu2  ;;  %v419_v55 = vpop.f32.mrf.mxu0 }
  0xfd   : > { %v595_v53 = vpop.f32.mrf.mxu3  ;;  %v542_v54 = vmax.f32 %v481_v51, %v534_v52  ;;  %v475_v56 = vpop.f32.mrf.mxu1 }
  0xff   : > { %v603_v57 = vmax.f32 %v542_v54, %v595_v53 }
 0x101   : > { %608 = vst.msk [vmem:[#allocation3 + $0x18] sm:$0xff] %vm388_vm0, %v603_v57 }
 0x104   : > { %v536_v58 = vpop.f32.mrf.mxu2 }
 0x105   : > { %v597_v59 = vpop.f32.mrf.mxu3 }
 0x106 PF: > { %v1927_v60 = vld [vmem:[%s1868_s18 + $0x30] sm:$0xff]  ;;  %v1930_v61 = vld [vmem:[%s1868_s18 + $0x38] sm:$0xff]  ;;  %v1933_v62 = vld [vmem:[%s1868_s18 + $0x20] sm:$0xff]  ;;  %vm622_vm1 = vcmask 523264   ;;  %vm689_vm2 = vcmask 1043456   ;;  %vm664_vm3 = vcmask 64512  }
 0x107   : > { %v620_v63 = vpack.c.bf16 %v1930_v61, %v1927_v60  ;;  %v1938_v0 = vld [vmem:[%s1868_s18 + $0x28] sm:$0xff]  ;;  %v1943_v2 = vld [vmem:[%s1868_s18 + $0x10] sm:$0xff]  ;;  %v1946_v3 = vld [vmem:[%s1868_s18 + $0x18] sm:$0xff]  ;;  %vm947_vm4 = vcmask 261120   ;;  %s989_s12 = sld [smem:[#allocation4]]  ;;  %s1299_s11 = sshll.u32 %s1651_s5, 4 }
 0x108   : > { %v619_v1 = vpack.c.bf16 %v1938_v0, %v1933_v62  ;;  %v618_v4 = vpack.c.bf16 %v1946_v3, %v1943_v2  ;;  %v1951_v5 = vld [vmem:[%s1868_s18] sm:$0xff]  ;;  %v1954_v6 = vld [vmem:[%s1868_s18 + $0x8] sm:$0xff]  ;;  %v621_v8 = vld [vmem:[%s2129_s2] sm:$0xf]  ;;  %s1026_s15 = sadd.s32 %s1647_s29, %s1299_s11  ;;  %s2157_s13 = sld [smem:[#allocation20_spill]] }
 0x109   : > { %630 = vmatpush.bf16.msra.mxu0 %v620_v63  ;;  %v617_v7 = vpack.c.bf16 %v1954_v6, %v1951_v5  ;;  %v639_v9 = vld [vmem:[#allocation2] sm:$0xff]  ;;  %s1300_s23 = sshll.u32 %s1026_s15, 3  ;;  %s1029_s16 = sshll.u32 %s1881_s6, 4  ;;  %s1030_s16 = int_to_ptr.vmem [resolvable:$true] %s1029_s16 }
 0x10a   : > { %v640_v10 = vpack.c.bf16 %v639_v9, %v639_v9  ;;  %s1016_s29 = scalar_lea.sflag [#allocation7], %s1864_s7 }
 0x10c   : > { %v691_v11 = vsel %vm689_vm2, %v640_v10, 0 }
 0x10d   : > { %631 = vmatpush.bf16.msra.mxu0 %v619_v1  ;;  %700 = vmatpush.bf16.msra.mxu1 %v691_v11 }
 0x10e   : > { %s1028_s0 = scalar_lea.hbm %s2157_s13, %s1300_s23 }
 0x10f   : > { %s1031_s17 = sshll.u32 %s1028_s0, 4  ;;  %s1032_s17 = int_to_ptr.hbm [resolvable:$true] %s1031_s17 }
 0x110   : > { %s1551_s5 = sshra.s32 %s1032_s17, 4  ;;  %s1552_s5 = int_to_ptr.hbm [resolvable:$true] %s1551_s5 }
 0x111   : > { %632 = vmatpush.bf16.msra.mxu0 %v618_v4  ;;  %s1553_s9 = scalar_lea.hbm %s1552_s5, 64  ;;  %p1558_p4 = scmp.lt.s32.totalorder %s1552_s5, %s2157_s13 }
 0x112   : > { %p1554_p10 = scmp.ne.s32.totalorder %s1552_s5, %s1553_s9 }
 0x114   : > { %p1555_p12 = pnand %p1554_p10, %p1792_p8 }
 0x115   : > { %633 = vmatpush.bf16.msra.mxu0 %v617_v7 }
 0x116   : > { %p1556_p1 = pneg %p1555_p12 }
 0x118   : > { %1266 = vmatmul.msk.bf16.vlgmr.msra.gmra.mxu0 %vm622_vm1, %v621_v8 }
 0x195   : > { %v635_v12 = vpop.f32.mrf.mxu0 }
 0x196   : > { %v647_v13 = vpack.c.bf16 %v635_v12, %v635_v12 }
 0x198   : > { %648 = vxpose.xlu0.c.b16.start.end [1/1] (short) %v647_v13, 128 }
 0x19d   : > { %v637_v14 = vpop.f32.mrf.mxu0 }
 0x244   : > { %v656_v15 = vpop.trf.xlu0 }
 0x245   : > { %1267 = vmatmul.msk.bf16.vlgmr.msra.gmra.mxu1 %vm664_vm3, %v656_v15 }
 0x254   : > { %v657_v16 = vpop.trf.xlu0 }
 0x255   : > { %1268 = vmatmul.msk.bf16.gmra.mxu1 %vm664_vm3, %v657_v16 }
 0x264   : > { %v658_v17 = vpop.trf.xlu0 }
 0x265   : > { %1269 = vmatmul.msk.bf16.gmra.mxu1 %vm664_vm3, %v658_v17 }
 0x274   : > { %v659_v18 = vpop.trf.xlu0 }
 0x275   : > { %1270 = vmatmul.msk.bf16.gmra.mxu1 %vm664_vm3, %v659_v18 }
 0x284   : > { %v660_v19 = vpop.trf.xlu0 }
 0x285   : > { %1271 = vmatmul.msk.bf16.gmra.mxu1 %vm664_vm3, %v660_v19 }
 0x294   : > { %v661_v20 = vpop.trf.xlu0 }
 0x295   : > { %1272 = vmatmul.msk.bf16.gmra.mxu1 %vm664_vm3, %v661_v20 }
 0x2a4   : > { %v662_v21 = vpop.trf.xlu0 }
 0x2a5   : > { %1273 = vmatmul.msk.bf16.gmra.mxu1 %vm664_vm3, %v662_v21 }
 0x2b4   : > { %v663_v22 = vpop.trf.xlu0 }
 0x2b5   : > { %1274 = vmatmul.msk.bf16.gmra.mxu1 %vm664_vm3, %v663_v22 }
 0x2c2   : > { %v1970_v23 = vpop.f32.mrf.mxu1 }
 0x2c3   : > { %v742_v50 = vsel %vm622_vm1, %v1970_v23, -inf }
 0x2ca   : > { %v1972_v24 = vpop.f32.mrf.mxu1 }
 0x2cb   : > { %v745_v54 = vsel %vm622_vm1, %v1972_v24, -inf }
 0x2d2   : > { %v1974_v25 = vpop.f32.mrf.mxu1 }
 0x2d3   : > { %v748_v48 = vsel %vm622_vm1, %v1974_v25, -inf }
 0x2da   : > { %v1976_v26 = vpop.f32.mrf.mxu1 }
 0x2db   : > { %v751_v53 = vsel %vm622_vm1, %v1976_v26, -inf }
 0x2e2   : > { %v1978_v27 = vpop.f32.mrf.mxu1 }
 0x2e3   : > { %v754_v46 = vsel %vm622_vm1, %v1978_v27, -inf }
 0x2ea   : > { %v1980_v28 = vpop.f32.mrf.mxu1 }
 0x2eb   : > { %v757_v52 = vsel %vm622_vm1, %v1980_v28, -inf }
 0x2f2   : > { %v1982_v29 = vpop.f32.mrf.mxu1 }
 0x2f3   : > { %v760_v44 = vsel %vm622_vm1, %v1982_v29, -inf }
 0x2fa   : > { %v1984_v30 = vpop.f32.mrf.mxu1 }
 0x2fb   : > { %v763_v51 = vsel %vm622_vm1, %v1984_v30, -inf }
 0x302   : > { %v1986_v31 = vpop.f32.mrf.mxu1 }
 0x303   : > { %v766_v42 = vsel %vm622_vm1, %v1986_v31, -inf }
 0x30a   : > { %v1988_v32 = vpop.f32.mrf.mxu1 }
 0x30b   : > { %v769_v49 = vsel %vm622_vm1, %v1988_v32, -inf }
 0x312   : > { %v1990_v33 = vpop.f32.mrf.mxu1 }
 0x313   : > { %v772_v39 = vsel %vm622_vm1, %v1990_v33, -inf }
 0x31a   : > { %v1992_v34 = vpop.f32.mrf.mxu1 }
 0x31b   : > { %v775_v47 = vsel %vm622_vm1, %v1992_v34, -inf }
 0x322   : > { %v732_v35 = vpop.f32.mrf.mxu1 }
 0x323   : > { %v778_v45 = vsel %vm622_vm1, %v732_v35, -inf }
 0x32a   : > { %v734_v36 = vpop.f32.mrf.mxu1 }
 0x32b   : > { %v781_v37 = vsel %vm622_vm1, %v734_v36, -inf }
 0x32c   : > { %782 = vmax.xlane.f32.xlu2 %v781_v37 }
 0x332   : > { %v737_v38 = vpop.f32.mrf.mxu1 }
 0x333   : > { %v784_v40 = vsel %vm622_vm1, %v737_v38, -inf }
 0x334   : > { %773 = vmax.xlane.f32.xlu2 %v772_v39  ;;  %785 = vmax.xlane.f32.xlu0 %v784_v40 }
 0x33a   : > { %v739_v41 = vpop.f32.mrf.mxu1 }
 0x33b   : > { %v787_v43 = vsel %vm622_vm1, %v739_v41, -inf }
 0x33c   : > { %767 = vmax.xlane.f32.xlu2 %v766_v42  ;;  %788 = vmax.xlane.f32.xlu1 %v787_v43 }
 0x344   : > { %761 = vmax.xlane.f32.xlu2 %v760_v44  ;;  %779 = vmax.xlane.f32.xlu1 %v778_v45 }
 0x34c   : > { %755 = vmax.xlane.f32.xlu2 %v754_v46  ;;  %776 = vmax.xlane.f32.xlu1 %v775_v47 }
 0x354   : > { %749 = vmax.xlane.f32.xlu2 %v748_v48  ;;  %770 = vmax.xlane.f32.xlu1 %v769_v49 }
 0x35c   : > { %743 = vmax.xlane.f32.xlu2 %v742_v50  ;;  %764 = vmax.xlane.f32.xlu1 %v763_v51 }
 0x364   : > { %758 = vmax.xlane.f32.xlu1 %v757_v52 }
 0x36c   : > { %752 = vmax.xlane.f32.xlu1 %v751_v53 }
 0x374   : > { %746 = vmax.xlane.f32.xlu1 %v745_v54 }
 0x39f   : > { %v783_v55 = vpop.xlane.xlu2 %782 }
 0x3a0   : > { %v803_v7 = vsub.f32 %v734_v36, %v783_v55 }
 0x3a2   : > { %v832_v9 = vmul.f32 1.442695, %v803_v7 }
 0x3a7   : > { %v786_v56 = vpop.xlane.xlu0 %785  ;;  %v774_v58 = vpop.xlane.xlu2 %773 }
 0x3a8   : > { %v804_v57 = vsub.f32 %v737_v38, %v786_v56  ;;  %v800_v15 = vsub.f32 %v1990_v33, %v774_v58 }
 0x3aa   : > { %v834_v63 = vmul.f32 1.442695, %v804_v57  ;;  %v826_v19 = vmul.f32 1.442695, %v800_v15 }
 0x3ac   : > { %1443 = vpow2.f32 %v834_v63 }
 0x3af   : > { %v789_v59 = vpop.xlane.xlu1 %788  ;;  %v768_v10 = vpop.xlane.xlu2 %767 }
 0x3b0   : > { %v805_v1 = vsub.f32 %v739_v41, %v789_v59  ;;  %v798_v37 = vsub.f32 %v1986_v31, %v768_v10 }
 0x3b2   : > { %v836_v4 = vmul.f32 1.442695, %v805_v1  ;;  %v1444_v12 = vpop.eup %1443  ;;  %v822_v40 = vmul.f32 1.442695, %v798_v37  ;;  %v642_v37 = vld [vmem:[#allocation3 + $0x8] sm:$0xff] }
 0x3b4   : > { %1445 = vpow2.f32 %v836_v4 }
 0x3b5   : > { %1447 = vpow2.f32 %v832_v9 }
 0x3b7   : > { %v780_v8 = vpop.xlane.xlu1 %779  ;;  %v762_v22 = vpop.xlane.xlu2 %761 }
 0x3b8   : > { %v802_v11 = vsub.f32 %v732_v35, %v780_v8  ;;  %v796_v44 = vsub.f32 %v1982_v29, %v762_v22 }
 0x3ba   : > { %v830_v13 = vmul.f32 1.442695, %v802_v11  ;;  %v1446_v14 = vpop.eup %1445  ;;  %v818_v48 = vmul.f32 1.442695, %v796_v44 }
 0x3bb   : > { %v845_v16 = vpack.c.bf16 %v1446_v14, %v1444_v12  ;;  %v1448_v21 = vpop.eup %1447 }
 0x3bc   : > { %1449 = vpow2.f32 %v830_v13 }
 0x3bd   : > { %v874_v17 = vsel %vm622_vm1, %v845_v16, 0  ;;  %1451 = vpow2.f32 %v826_v19 }
 0x3be   : > { %876 = vmatpush.bf16.xpose.msra.mxu2 %v874_v17  ;;  %898 = vmatpush.bf16.xpose.msra.mxu3 %v874_v17 }
 0x3bf   : > { %v777_v18 = vpop.xlane.xlu1 %776  ;;  %v756_v45 = vpop.xlane.xlu2 %755 }
 0x3c0   : > { %v801_v20 = vsub.f32 %v1992_v34, %v777_v18  ;;  %v794_v52 = vsub.f32 %v1978_v27, %v756_v45 }
 0x3c2   : > { %v828_v36 = vmul.f32 1.442695, %v801_v20  ;;  %v1450_v35 = vpop.eup %1449  ;;  %v814_v55 = vmul.f32 1.442695, %v794_v52  ;;  %v1322_v52 = vld [vmem:[%s2131_s4] sm:$0xff] }
 0x3c3   : > { %v844_v38 = vpack.c.bf16 %v1448_v21, %v1450_v35  ;;  %v1452_v42 = vpop.eup %1451  ;;  %v641_v35 = vld [vmem:[#allocation3] sm:$0xff] }
 0x3c4   : > { %1453 = vpow2.f32 %v828_v36 }
 0x3c5   : > { %v871_v33 = vsel %vm622_vm1, %v844_v38, 0  ;;  %1455 = vpow2.f32 %v822_v40  ;;  %v1670_v38 = vmov 1065369472  }
 0x3c6   : > { %877 = vmatpush.bf16.xpose.msra.mxu2 %v871_v33  ;;  %899 = vmatpush.bf16.xpose.msra.mxu3 %v871_v33  ;;  %v643_v33 = vld [vmem:[#allocation3 + $0x10] sm:$0xff] }
 0x3c7   : > { %v771_v39 = vpop.xlane.xlu1 %770  ;;  %v750_v29 = vpop.xlane.xlu2 %749 }
 0x3c8   : > { %v799_v41 = vsub.f32 %v1988_v32, %v771_v39  ;;  %v792_v63 = vsub.f32 %v1974_v25, %v750_v29  ;;  %v644_v39 = vld [vmem:[#allocation3 + $0x18] sm:$0xff]  ;;  %v1324_v29 = vld [vmem:[%s2131_s4 + $0x10] sm:$0xff] }
 0x3c9   : > { %v646_v40 = vpack.c.bf16 %v644_v39, %v643_v33 }
 0x3ca   : > { %v824_v43 = vmul.f32 1.442695, %v799_v41  ;;  %v1454_v34 = vpop.eup %1453  ;;  %v810_v4 = vmul.f32 1.442695, %v792_v63 }
 0x3cb   : > { %v843_v46 = vpack.c.bf16 %v1454_v34, %v1452_v42  ;;  %v1456_v50 = vpop.eup %1455 }
 0x3cc   : > { %1457 = vpow2.f32 %v824_v43 }
 0x3cd   : > { %v868_v31 = vsel %vm622_vm1, %v843_v46, 0  ;;  %1459 = vpow2.f32 %v818_v48 }
 0x3ce   : > { %878 = vmatpush.bf16.xpose.msra.mxu2 %v868_v31  ;;  %900 = vmatpush.bf16.xpose.msra.mxu3 %v868_v31 }
 0x3cf   : > { %v765_v47 = vpop.xlane.xlu1 %764  ;;  %v744_v8 = vpop.xlane.xlu2 %743 }
 0x3d0   : > { %v797_v49 = vsub.f32 %v1984_v30, %v765_v47  ;;  %v790_v12 = vsub.f32 %v1970_v23, %v744_v8 }
 0x3d2   : > { %v820_v51 = vmul.f32 1.442695, %v797_v49  ;;  %v1458_v32 = vpop.eup %1457  ;;  %v806_v14 = vmul.f32 1.442695, %v790_v12 }
 0x3d3   : > { %v842_v53 = vpack.c.bf16 %v1458_v32, %v1456_v50  ;;  %v1460_v58 = vpop.eup %1459 }
 0x3d4   : > { %1461 = vpow2.f32 %v820_v51 }
 0x3d5   : > { %v865_v54 = vsel %vm622_vm1, %v842_v53, 0  ;;  %1463 = vpow2.f32 %v814_v55  ;;  %v1323_v53 = vld [vmem:[%s2131_s4 + $0x8] sm:$0xff]  ;;  %v990_v55 = vstv %s989_s12  ;;  %s1557_s12 = scalar_lea.hbm %s2157_s13, 256 }
 0x3d6   : > { %879 = vmatpush.bf16.xpose.msra.mxu2 %v865_v54  ;;  %901 = vmatpush.bf16.xpose.msra.mxu3 %v865_v54  ;;  %v1325_v54 = vld [vmem:[%s2131_s4 + $0x18] sm:$0xff]  ;;  %p1559_p6 = scmp.lt.s32.totalorder %s1557_s12, %s1553_s9 }
 0x3d7   : > { %v759_v56 = vpop.xlane.xlu1 %758 }
 0x3d8   : > { %v795_v57 = vsub.f32 %v1980_v28, %v759_v56  ;;  %p1560_p3 = por %p1559_p6, %p1558_p4 }
 0x3da   : > { %v816_v59 = vmul.f32 1.442695, %v795_v57  ;;  %v1462_v30 = vpop.eup %1461  ;;  %p1561_p7 = pnand %p1560_p3, %p1556_p1 }
 0x3db   : > { %v841_v27 = vpack.c.bf16 %v1462_v30, %v1460_v58  ;;  %v1464_v10 = vpop.eup %1463 }
 0x3dc   : > { %1465 = vpow2.f32 %v816_v59 }
 0x3dd   : > { %v862_v1 = vsel %vm622_vm1, %v841_v27, 0  ;;  %1467 = vpow2.f32 %v810_v4 }
 0x3de   : > { %880 = vmatpush.bf16.xpose.msra.mxu2 %v862_v1  ;;  %902 = vmatpush.bf16.xpose.msra.mxu3 %v862_v1 }
 0x3df   : > { %v753_v7 = vpop.xlane.xlu1 %752 }
 0x3e0   : > { %v793_v9 = vsub.f32 %v1976_v26, %v753_v7 }
 0x3e2   : > { %v1466_v11 = vpop.eup %1465  ;;  %v812_v28 = vmul.f32 1.442695, %v793_v9 }
 0x3e3   : > { %v840_v13 = vpack.c.bf16 %v1466_v11, %v1464_v10  ;;  %v1468_v17 = vpop.eup %1467 }
 0x3e4   : > { %1469 = vpow2.f32 %v812_v28 }
 0x3e5   : > { %v859_v25 = vsel %vm622_vm1, %v840_v13, 0  ;;  %1471 = vpow2.f32 %v806_v14 }
 0x3e6   : > { %881 = vmatpush.bf16.xpose.msra.mxu2 %v859_v25  ;;  %903 = vmatpush.bf16.xpose.msra.mxu3 %v859_v25 }
 0x3e7   : > { %v747_v15 = vpop.xlane.xlu1 %746 }
 0x3e8   : > { %v791_v16 = vsub.f32 %v1972_v24, %v747_v15  ;;  %v645_v24 = vpack.c.bf16 %v642_v37, %v641_v35 }
 0x3ea   : > { %v1470_v18 = vpop.eup %1469  ;;  %v808_v19 = vmul.f32 1.442695, %v791_v16 }
 0x3eb   : > { %v839_v26 = vpack.c.bf16 %v1470_v18, %v1468_v17  ;;  %v1472_v23 = vpop.eup %1471 }
 0x3ec   : > { %1473 = vpow2.f32 %v808_v19 }
 0x3ed   : > { %v856_v20 = vsel %vm622_vm1, %v839_v26, 0 }
 0x3ee   : > { %882 = vmatpush.bf16.xpose.msra.mxu2 %v856_v20  ;;  %904 = vmatpush.bf16.xpose.msra.mxu3 %v856_v20 }
 0x3f2   : > { %v1474_v21 = vpop.eup %1473 }
 0x3f3   : > { %v838_v22 = vpack.c.bf16 %v1474_v21, %v1472_v23 }
 0x3f5   : > { %v853_v36 = vsel %vm622_vm1, %v838_v22, 0 }
 0x3f6   : > { %883 = vmatpush.bf16.xpose.msra.mxu2 %v853_v36  ;;  %905 = vmatpush.bf16.xpose.msra.mxu3 %v853_v36 }
 0x3fd   : > { %1275 = vmatmul.msk.bf16.vlgmr.msra.gmra.mxu2 %vm622_vm1, %v645_v24  ;;  %1277 = vmatmul.msk.bf16.vlgmr.msra.gmra.mxu3 %vm622_vm1, %v1670_v38 }
 0x40d   : > { %1276 = vmatmul.msk.bf16.gmra.mxu2 %vm622_vm1, %v646_v40 }
 0x480   : > { %v885_v41 = vpop.f32.mrf.mxu2  ;;  %v907_v42 = vpop.f32.mrf.mxu3 }
 0x481   : > { %1475 = vrcp.f32 %v907_v42 }
 0x487   : > { %v1476_v45 = vpop.eup %1475 }
 0x488   : > { %v887_v43 = vpop.f32.mrf.mxu2  ;;  %v909_v34 = vpop.f32.mrf.mxu3  ;;  %v912_v46 = vperm.slane %v1476_v45, 0 }
 0x48a   : > { %v914_v49 = vmul.f32 %v912_v46, %v887_v43  ;;  %v913_v51 = vmul.f32 %v912_v46, %v885_v41 }
 0x48c   : > { %v925_v32 = vpack.c.bf16 %v914_v49, %v913_v51 }
 0x490   : > { %v890_v44 = vpop.f32.mrf.mxu2 }
 0x491   : > { %v915_v47 = vmul.f32 %v912_v46, %v890_v44 }
 0x498   : > { %v892_v31 = vpop.f32.mrf.mxu2 }
 0x499   : > { %v916_v48 = vmul.f32 %v912_v46, %v892_v31 }
 0x49b   : > { %v926_v50 = vpack.c.bf16 %v916_v48, %v915_v47 }
 0x49d   : > { %966 = vmatpush.bf16.msrb.mxu0 %v926_v50 }
 0x4a1   : > { %967 = vmatpush.bf16.msrb.mxu0 %v925_v32 }
 0x4a4   : > { %1294 = vmatmul.msk.bf16.vlgmr.msrb.gmra.mxu0 %vm947_vm4, %v1322_v52 }
 0x4b4   : > { %1295 = vmatmul.msk.bf16.gmra.mxu0 %vm947_vm4, %v1323_v53 }
 0x4c4   : > { %1296 = vmatmul.msk.bf16.gmra.mxu0 %vm947_vm4, %v1324_v29 }
 0x4d4   : > { %1297 = vmatmul.msk.bf16.gmra.mxu0 %vm947_vm4, %v1325_v54 }
 0x521   : > { %v969_v56 = vpop.f32.mrf.mxu0 }
 0x522   : > { %v991_v57 = vmul.f32 %v990_v55, %v969_v56 }
 0x524   : > { %v999_v58 = vadd.f32 %v991_v57, %v1951_v5 }
 0x526   : > { %1007 = vst [vmem:[%s1881_s6] sm:$0xff] %v999_v58 }
 0x529   : > { %v971_v59 = vpop.f32.mrf.mxu0 }
 0x52a   : > { %v992_v30 = vmul.f32 %v990_v55, %v971_v59 }
 0x52c   : > { %v1000_v63 = vadd.f32 %v992_v30, %v1954_v6 }
 0x52e   : > { %1008 = vst [vmem:[%s1881_s6 + $0x8] sm:$0xff] %v1000_v63 }
 0x531   : > { %v974_v27 = vpop.f32.mrf.mxu0 }
 0x532   : > { %v993_v1 = vmul.f32 %v990_v55, %v974_v27 }
 0x534   : > { %v1001_v4 = vadd.f32 %v993_v1, %v1943_v2 }
 0x536   : > { %1009 = vst [vmem:[%s1881_s6 + $0x10] sm:$0xff] %v1001_v4 }
 0x539   : > { %v976_v7 = vpop.f32.mrf.mxu0 }
 0x53a   : > { %v994_v8 = vmul.f32 %v990_v55, %v976_v7 }
 0x53c   : > { %v1002_v9 = vadd.f32 %v994_v8, %v1946_v3 }
 0x53e   : > { %1010 = vst [vmem:[%s1881_s6 + $0x18] sm:$0xff] %v1002_v9 }
 0x541   : > { %v979_v5 = vpop.f32.mrf.mxu0 }
 0x542   : > { %v995_v10 = vmul.f32 %v990_v55, %v979_v5 }
 0x544   : > { %v1003_v6 = vadd.f32 %v995_v10, %v1933_v62 }
 0x546   : > { %1011 = vst [vmem:[%s1881_s6 + $0x20] sm:$0xff] %v1003_v6 }
 0x549   : > { %v981_v11 = vpop.f32.mrf.mxu0 }
 0x54a   : > { %v996_v28 = vmul.f32 %v990_v55, %v981_v11 }
 0x54c   : > { %v1004_v12 = vadd.f32 %v996_v28, %v1938_v0 }
 0x54e   : > { %1012 = vst [vmem:[%s1881_s6 + $0x28] sm:$0xff] %v1004_v12 }
 0x551   : > { %v984_v2 = vpop.f32.mrf.mxu0 }
 0x552   : > { %v997_v13 = vmul.f32 %v990_v55, %v984_v2 }
 0x554   : > { %v1005_v3 = vadd.f32 %v997_v13, %v1927_v60 }
 0x556   : > { %1013 = vst [vmem:[%s1881_s6 + $0x30] sm:$0xff] %v1005_v3 }
 0x559   : > { %v986_v62 = vpop.f32.mrf.mxu0 }
 0x55a   : > { %v998_v0 = vmul.f32 %v990_v55, %v986_v62 }
 0x55c   : > { %v1006_v25 = vadd.f32 %v998_v0, %v1930_v61 }
 0x55e   : > { %1014 = vst [vmem:[%s1881_s6 + $0x38] sm:$0xff] %v1006_v25 }
 0x55f   : > { %1564 = shalt.err (!%p1561_p7)
}
 0x560   : > { %s1671_s7 = smov 128   ;;  %s1672_s6 = smov 256  }
 0x561   : > { %s1673_s23 = smov 8  }
 0x562   : > { %1330 = dma.vmem_to_hbm [thread:$0]  (%p1792_p8), %s1030_s16, 1024, %s1032_s17, %s1016_s29, %s1671_s7, %s1672_s6, %s1673_s23  }
 0x563 PF: > { %p1344_p11 = scmp.ge.s32.totalorder %s1663_s8, 2  ;;  %s1046_s14 = sand.u32 1, %s1635_s26  }
 0x564   : > { %s1047_s0 = scalar_lea.sflag [#allocation7], %s1046_s14 }
 0x565   : > { %p1340_p13 = pnand %p1344_p11, %p1799_p9 }
 0x567   : > { %p1341_p0 = pneg %p1340_p13 }
 0x569   : > { %1618 = dma.done.wait (%p1341_p0), %s1047_s0, 1024  }
 0x56a   : > { %1620 = vsyncadd (%p1341_p0), %s1047_s0, 4294966272  ;;  %s26_s8 = sadd.s32 1, %s1663_s8   ;;  %s2160_s5 = sld [smem:[#allocation14_spill]] }
 0x56b   : > { %p23_p5 = scmp.ge.s32.totalorder %s26_s8, 6   ;;  %s2161_s18 = sld [smem:[#allocation15_spill]] }
 0x56c   : > { %s2162_s7 = sld [smem:[#allocation16_spill]]  ;;  %s2163_s23 = smov %s1627_s24 }
 0x56d   : > { %s2164_s24 = smov %s1631_s25  ;;  %s2165_s25 = smov %s1835_s21 }
 0x56e   : > { %s2166_s26 = smov %s1639_s27  ;;  %s2167_s27 = smov %s1643_s28 }
 0x56f   : > { %s2168_s28 = smov %s1813_s22  ;;  %s2169_s29 = smov %s1655_s30 }
 0x570   :  { %25 = sbr.rel (!%p23_p5) target bundleno = 15 (0xf), region = 109 }
 0x571   : > { %s2170_s30 = smov %s2161_s18 }
 0x575   :  { %1053 = vsyncpa [#allocation6], 1 }
 0x576   :  { %1055 = vsyncpa [#allocation6 + $0x1], 1 }
 0x577   :  { %1056 = vsyncpa [#allocation9], 1 }
 0x578   :  { %1058 = vsyncpa [#allocation9 + $0x1], 1 }
 0x579   :  { %1059 = vsyncpa [#allocation7], 1 }
 0x57a   :  { %1061 = vsyncpa [#allocation7 + $0x1], 1 }

</bundles_post_ra>
